<compile_context>
chip_gen: v6e
topology: v6e:2x2x1
jax: 0.10.0
libtpu: 0.0.40
codegen_flags: <defaults>
</compile_context>

<pallas_src>
import functools

import jax
import jax.numpy as jnp
from jax import lax
from jax.experimental import pallas as pl
from jax.experimental.pallas import tpu as pltpu

LANE = 128        # lane-dense width for hidden activations / weight lanes
HIDDEN = 64       # true hidden width of the DQN

# Packed-parameter slab row offsets (all multiples of 8 -> sublane aligned).
W1_OFF = 0          # 128 rows : W1,   valid [:state_size, :HIDDEN]
W2_OFF = 128        # 128 rows : W2,   valid [:HIDDEN,     :HIDDEN]
B1_OFF = 256        #   8 rows : row 0 = b1 (lanes [:HIDDEN])
B2_OFF = 264        #   8 rows : row 0 = b2 (lanes [:HIDDEN])
W3T_OFF = 272       # out_rows : W3^T, valid [:action_size, :HIDDEN]
                    # out_rows : b3 as a column at lane 0 (immediately after W3^T)


def _round_up(n, m):
    return ((n + m - 1) // m) * m


def _out_rows(action_size):
    return _round_up(max(action_size, 1), 8)


def _p_rows(action_size):
    return W3T_OFF + 2 * _out_rows(action_size)


def _dqn_kernel(x_ref, p_ref, qt_ref, *, state_size, out_rows):
    """One batch tile.

    x_ref : [tb, state_size]   states, batch on sublanes
    p_ref : [p_rows, 128]      packed, zero-padded parameter slab
    qt_ref: [out_rows, tb]     TRANSPOSED Q-values (lane-dense along batch)
    """
    x = x_ref[...]

    # NOTE: these ref slices are loads, not free views; every start row is
    # 8-aligned so they stay cheap.
    w1 = p_ref[W1_OFF:W1_OFF + state_size, :]                       # [S, 128]
    w2 = p_ref[W2_OFF:W2_OFF + LANE, :]                             # [128, 128]
    b1 = p_ref[B1_OFF:B1_OFF + 1, :]                                # [1, 128]
    b2 = p_ref[B2_OFF:B2_OFF + 1, :]                                # [1, 128]
    w3t = p_ref[W3T_OFF:W3T_OFF + out_rows, :]                      # [R, 128]
    b3c = p_ref[W3T_OFF + out_rows:W3T_OFF + 2 * out_rows, 0:1]     # [R, 1]

    # Zero padding in weights/biases keeps padded lanes exactly 0 through both
    # ReLUs, so padded hidden lanes / output rows never contaminate real values.
    h1 = jnp.maximum(jnp.dot(x, w1, preferred_element_type=jnp.float32) + b1, 0.0)
    h2 = jnp.maximum(jnp.dot(h1, w2, preferred_element_type=jnp.float32) + b2, 0.0)

    # Transposed output block: contract h2's hidden (lane) axis with W3^T's
    # hidden (lane) axis -> [out_rows, tb].  Writeback is lane-dense along the
    # batch and ~16x smaller than a [tb, 128] slab.
    qt = lax.dot_general(w3t, h2, (((1,), (1,)), ((), ())),
                         preferred_element_type=jnp.float32) + b3c
    qt_ref[...] = qt.astype(qt_ref.dtype)


def pack_params(params, state_size, action_size):
    """Pack all DQN parameters into one zero-padded f32 slab [p_rows, 128].

    Weights W1/W2 are stored [in_features, out_features] (kernel does x @ W);
    W3 is stored transposed ([action, hidden]) for the transposed output block;
    b1/b2 are stored as lane-rows, b3 as a sublane-column at lane 0.
    """
    assert 1 <= state_size <= LANE
    assert action_size >= 1
    out_rows = _out_rows(action_size)
    p_rows = _p_rows(action_size)

    w1 = jnp.asarray(params["w1"], jnp.float32)   # [S, 64]
    w2 = jnp.asarray(params["w2"], jnp.float32)   # [64, 64]
    w3 = jnp.asarray(params["w3"], jnp.float32)   # [64, A]
    b1 = jnp.asarray(params["b1"], jnp.float32)
    b2 = jnp.asarray(params["b2"], jnp.float32)
    b3 = jnp.asarray(params["b3"], jnp.float32)

    P = jnp.zeros((p_rows, LANE), jnp.float32)
    P = P.at[W1_OFF:W1_OFF + state_size, :HIDDEN].set(w1)
    P = P.at[W2_OFF:W2_OFF + HIDDEN, :HIDDEN].set(w2)
    P = P.at[B1_OFF, :HIDDEN].set(b1)
    P = P.at[B2_OFF, :HIDDEN].set(b2)
    P = P.at[W3T_OFF:W3T_OFF + action_size, :HIDDEN].set(w3.T)
    P = P.at[W3T_OFF + out_rows:W3T_OFF + out_rows + action_size, 0].set(b3)
    return P


@functools.partial(jax.jit, static_argnames=("state_size", "action_size"))
def dqn_forward(x, packed_params, *, state_size, action_size):
    """Returns Q-values [B, action_size] -- matches DQN.forward."""
    assert x.ndim == 2 and x.shape[1] == state_size
    assert 1 <= state_size <= LANE, "state_size must be <= 128"
    assert action_size >= 1

    out_rows = _out_rows(action_size)
    p_rows = _p_rows(action_size)
    # Guard against a slab packed for a different action_size (silent misread).
    assert packed_params.shape == (p_rows, LANE), (
        f"packed_params shape {packed_params.shape} does not match "
        f"expected {(p_rows, LANE)} for action_size={action_size}; "
        "re-run pack_params with matching sizes.")
    assert packed_params.dtype == jnp.float32

    B = x.shape[0]
    x32 = x.astype(jnp.float32)

    if B <= 512:
        # Inference / small-batch path: one grid step, no wrapper-side padding
        # of x (full-dim blocks), output sliced/transposed once below.
        tb, b_pad, n_tiles = B, B, 1
        x_in = x32
    else:
        # Large-batch path: big tiles amortize per-grid-step overhead; cap so
        # there are always >= 2 tiles (keeps both TensorCores busy on v7x).
        tb = min(2048, _round_up(pl.cdiv(B, 2), LANE))
        b_pad = _round_up(B, tb)
        n_tiles = b_pad // tb
        x_in = jnp.pad(x32, ((0, b_pad - B), (0, 0)))   # batch-pad only

    qt = pl.pallas_call(
        functools.partial(_dqn_kernel, state_size=state_size, out_rows=out_rows),
        out_shape=jax.ShapeDtypeStruct((out_rows, b_pad), jnp.float32),
        grid=(n_tiles,),
        in_specs=[
            # States: batch tiled on sublanes; feature dim equals the full
            # array dim, so no (8,128) padding of the input is required.
            pl.BlockSpec((tb, state_size), lambda i: (i, 0)),
            # Packed params: grid-invariant block, DMA'd once.
            pl.BlockSpec((p_rows, LANE), lambda i: (0, 0)),
        ],
        # Transposed Q-values: lane-dense along the batch axis.
        out_specs=pl.BlockSpec((out_rows, tb), lambda i: (0, i)),
        compiler_params=pltpu.CompilerParams(dimension_semantics=("parallel",)),
    )(x_in, packed_params)

    # Tiny [A, B] -> [B, A] slice+transpose (layout plumbing only).
    return qt[:action_size, :B].T


def init_params(key, state_size, action_size, hidden=HIDDEN):
    """Deterministic synthetic init (uniform, like PyTorch's nn.Linear default)."""
    ks = jax.random.split(key, 6)

    def lin(kw, kb, fan_in, fan_out):
        bound = 1.0 / jnp.sqrt(fan_in)
        w = jax.random.uniform(kw, (fan_in, fan_out), jnp.float32, -bound, bound)
        b = jax.random.uniform(kb, (fan_out,), jnp.float32, -bound, bound)
        return w, b

    w1, b1 = lin(ks[0], ks[1], state_size, hidden)
    w2, b2 = lin(ks[2], ks[3], hidden, hidden)
    w3, b3 = lin(ks[4], ks[5], hidden, action_size)
    return {"w1": w1, "b1": b1, "w2": w2, "b2": b2, "w3": w3, "b3": b3}


def dqn_forward_ref(x, p):
    """Pure-JAX reference of the PyTorch DQN.forward."""
    h1 = jnp.maximum(x @ p["w1"] + p["b1"], 0.0)
    h2 = jnp.maximum(h1 @ p["w2"] + p["b2"], 0.0)
    return h2 @ p["w3"] + p["b3"]


if __name__ == "__main__":
    key = jax.random.PRNGKey(0)
    k_params, k_small, k_odd, k_big = jax.random.split(key, 4)

    state_size, action_size = 4, 2          # e.g. [pos, vel, angle, ang_vel] -> [left, right]
    params = init_params(k_params, state_size, action_size)
    packed = pack_params(params, state_size, action_size)   # pack ONCE, reuse per call

    def check(xb):
        q = dqn_forward(xb, packed, state_size=state_size, action_size=action_size)
        jax.block_until_ready(q)
        q_ref = dqn_forward_ref(xb, params)
        assert q.shape == (xb.shape[0], action_size)
        assert jnp.allclose(q, q_ref, atol=1e-4, rtol=1e-4)

    # Small-batch (inference) path: single tile, x passed unpadded.
    check(jax.random.normal(k_small, (8, state_size), dtype=jnp.float32))

    # Odd batch (not a multiple of 8): full-dim blocks still apply.
    check(jax.random.normal(k_odd, (5, state_size), dtype=jnp.float32))

    # Larger batch exercises the multi-tile ("parallel",) grid path (2 x 384-row tiles).
    check(jax.random.normal(k_big, (600, state_size), dtype=jnp.float32))

    print("KERNEL_OK")
</pallas_src>

<mosaic_0001>
module attributes {stable_mosaic.version = 11 : i64} {
  func.func @_dqn_kernel(%arg0: i32, %arg1: memref<8x4xf32, #tpu.memory_space<vmem>>, %arg2: memref<288x128xf32, #tpu.memory_space<vmem>>, %arg3: memref<8x8xf32, #tpu.memory_space<vmem>>) attributes {dimension_semantics = [#tpu.dimension_semantics<parallel>], iteration_bounds = array<i64: 1>, scalar_prefetch = 0 : i64, scratch_operands = 0 : i64, tpu.core_type = #tpu.core_type<tc>, window_params = [{transform_indices = @transform_0, window_bounds = array<i64: 8, 4>}, {pipeline_mode = #tpu.pipeline_mode<synchronous>, transform_indices = @transform_1, window_bounds = array<i64: 288, 128>}, {transform_indices = @transform_2, window_bounds = array<i64: 8, 8>}]} {
    %c0 = arith.constant 0 : index
    %c0_0 = arith.constant 0 : index
    %0 = vector.load %arg1[%c0, %c0_0] : memref<8x4xf32, #tpu.memory_space<vmem>>, vector<8x4xf32>
    %c0_1 = arith.constant 0 : index
    %c0_2 = arith.constant 0 : index
    %1 = vector.load %arg2[%c0_1, %c0_2] : memref<288x128xf32, #tpu.memory_space<vmem>>, vector<4x128xf32>
    %c128 = arith.constant 128 : index
    %c0_3 = arith.constant 0 : index
    %2 = vector.load %arg2[%c128, %c0_3] : memref<288x128xf32, #tpu.memory_space<vmem>>, vector<128x128xf32>
    %c256 = arith.constant 256 : index
    %c0_4 = arith.constant 0 : index
    %3 = vector.load %arg2[%c256, %c0_4] : memref<288x128xf32, #tpu.memory_space<vmem>>, vector<1x128xf32>
    %c264 = arith.constant 264 : index
    %c0_5 = arith.constant 0 : index
    %4 = vector.load %arg2[%c264, %c0_5] : memref<288x128xf32, #tpu.memory_space<vmem>>, vector<1x128xf32>
    %c272 = arith.constant 272 : index
    %c0_6 = arith.constant 0 : index
    %5 = vector.load %arg2[%c272, %c0_6] : memref<288x128xf32, #tpu.memory_space<vmem>>, vector<8x128xf32>
    %c280 = arith.constant 280 : index
    %c0_7 = arith.constant 0 : index
    %6 = vector.load %arg2[%c280, %c0_7] : memref<288x128xf32, #tpu.memory_space<vmem>>, vector<8x1xf32>
    %cst = arith.constant dense<0.000000e+00> : vector<8x128xf32>
    %7 = tpu.matmul %0, %1, %cst {dimension_numbers = #tpu.dot_dimension_numbers<[1], [0], [0], [1], [0, 0, 1, 1], [], []>} : vector<8x4xf32>, vector<4x128xf32>, vector<8x128xf32> -> vector<8x128xf32>
    %8 = vector.broadcast %3 : vector<1x128xf32> to vector<8x128xf32>
    %9 = arith.addf %7, %8 : vector<8x128xf32>
    %cst_8 = arith.constant 0.000000e+00 : f32
    %10 = vector.broadcast %cst_8 : f32 to vector<8x128xf32>
    %11 = arith.maximumf %9, %10 : vector<8x128xf32>
    %cst_9 = arith.constant dense<0.000000e+00> : vector<8x128xf32>
    %12 = tpu.matmul %11, %2, %cst_9 {dimension_numbers = #tpu.dot_dimension_numbers<[1], [0], [0], [1], [0, 0, 1, 1], [], []>} : vector<8x128xf32>, vector<128x128xf32>, vector<8x128xf32> -> vector<8x128xf32>
    %13 = vector.broadcast %4 : vector<1x128xf32> to vector<8x128xf32>
    %14 = arith.addf %12, %13 : vector<8x128xf32>
    %cst_10 = arith.constant 0.000000e+00 : f32
    %15 = vector.broadcast %cst_10 : f32 to vector<8x128xf32>
    %16 = arith.maximumf %14, %15 : vector<8x128xf32>
    %cst_11 = arith.constant dense<0.000000e+00> : vector<8x8xf32>
    %17 = tpu.matmul %5, %16, %cst_11 {dimension_numbers = #tpu.dot_dimension_numbers<[1], [1], [0], [0], [0, 0, 1, 0], [], []>} : vector<8x128xf32>, vector<8x128xf32>, vector<8x8xf32> -> vector<8x8xf32>
    %18 = vector.broadcast %6 : vector<8x1xf32> to vector<8x8xf32>
    %19 = arith.addf %17, %18 : vector<8x8xf32>
    %c0_12 = arith.constant 0 : index
    %c0_13 = arith.constant 0 : index
    %20 = vector.load %arg3[%c0_12, %c0_13] : memref<8x8xf32, #tpu.memory_space<vmem>>, vector<8x8xf32>
    tpu.vector_store %arg3[%c0_12, %c0_13], %19 {strides = array<i32>} : memref<8x8xf32, #tpu.memory_space<vmem>>, vector<8x8xf32>,
    return
  }
  func.func @transform_0(%arg0: i32) -> (i32, i32) {
    %c0_i32 = arith.constant 0 : i32
    %c0_i32_0 = arith.constant 0 : i32
    return %arg0, %c0_i32 : i32, i32
  }
  func.func @transform_1(%arg0: i32) -> (i32, i32) {
    %c0_i32 = arith.constant 0 : i32
    %c0_i32_0 = arith.constant 0 : i32
    %c0_i32_1 = arith.constant 0 : i32
    return %c0_i32, %c0_i32_0 : i32, i32
  }
  func.func @transform_2(%arg0: i32) -> (i32, i32) {
    %c0_i32 = arith.constant 0 : i32
    %c0_i32_0 = arith.constant 0 : i32
    return %c0_i32, %arg0 : i32, i32
  }
}

</mosaic_0001>

<bundles_post_ra>
// kernel: dqn_forward.1
= control target key start
LH: loop header
LB: loop body
LE: loop exit
PB: predicated region body
PF: predicated region fallthrough
CT: control target
= control target key end

     0   :  { %7 = vsyncpa [#allocation3], 0  ;;  %s386_s9 = smov [#allocation2]   ;;  %s419_s0 = inlined_call_operand.vmem [shape: f32[8,4], index: 0, kind: input, shape index: {}]   ;;  %s420_s1 = inlined_call_operand.hbm [shape: f32[288,128], index: 1, kind: input, shape index: {}]   ;;  %s421_s2 = inlined_call_operand.vmem [shape: f32[8,8], index: 2, kind: output, shape index: {}]  }
   0x1   :  { %s15_s10 = sshll.u32 %s386_s9, 4  ;;  %s16_s10 = int_to_ptr.vmem [resolvable:$true] %s15_s10 }
   0x2   :  { %s372_s11 = scalar_lea.vmem %s16_s10, 4608  ;;  %p377_p1 = scmp.lt.s32.totalorder %s16_s10, %s16_s10 }
   0x3   :  { %p373_p0 = scmp.ne.s32.totalorder %s16_s10, %s372_s11  ;;  %p378_p2 = scmp.lt.s32.totalorder %s372_s11, %s372_s11 }
   0x5   :  { %p379_p3 = por %p378_p2, %p377_p1 }
   0x7   :  { %p380_p4 = pnand %p379_p3, %p373_p0 }
   0x9   :  { %383 = shalt.err (!%p380_p4)
}
   0xa   :  { %s387_s12 = smov 128   ;;  %s388_s13 = smov 8  }
   0xb   :  { %21 = dma.hbm_to_vmem [thread:$0]  %s420_s1, 4608, %s16_s10, [#allocation3], %s387_s12, %s387_s12, %s388_s13  }
   0xc   :  { %384 = dma.done.wait [#allocation3], 4608  }
   0xd   :  { %385 = vsyncadd [#allocation3], 4294962688  ;;  %v389_v0 = vmov 0.0   ;;  %vm390_vm0 = vmmov 0   ;;  %vm55_vm1 = vcmask 1043456   ;;  %vm51_vm2 = vcmask 31744  }
   0xe   :  { %312 = vmatprep.subr.mxu0 %v389_v0  ;;  %314 = vmatprep.mubr.msk.f32.mxu0 %vm390_vm0, %v389_v0  ;;  %v26_v1 = vld [vmem:[#allocation2] sm:$0xf]  ;;  %v42_v3 = vld [vmem:[#allocation2 + $0xf8] sm:$0xff]  ;;  %v41_v4 = vld [vmem:[#allocation2 + $0xf0] sm:$0xff]  ;;  %v391_v25 = vmov 0   ;;  %vm280_vm3 = vcmask 64512  }
   0xf   :  { %317 = vmatprep.subr.mxu1 %v389_v0  ;;  %349 = vmatprep.mubr.msk.f32.mxu1 %vm390_vm0, %v389_v0  ;;  %v25_v2 = vld [vmem:[%s419_s0] sm:$0xff]  ;;  %v40_v5 = vld [vmem:[#allocation2 + $0xe8] sm:$0xff]  ;;  %v38_v7 = vld [vmem:[#allocation2 + $0xd8] sm:$0xff] }
  0x10   :  { %313 = vmatpush3.msk.msra.mxu0 %vm55_vm1, %v26_v1  ;;  %318 = vmatpush3.msra.mxu1 %v42_v3  ;;  %v39_v6 = vld [vmem:[#allocation2 + $0xe0] sm:$0xff]  ;;  %v37_v8 = vld [vmem:[#allocation2 + $0xd0] sm:$0xff]  ;;  %v36_v9 = vld [vmem:[#allocation2 + $0xc8] sm:$0xff] }
  0x11   :  { %315 = vmatmul.mubr.msk.f32.vlgmr.msra.gmra.mxu0 %vm51_vm2, %v25_v2  ;;  %319 = vmatprep.subr.mxu1 %v389_v0  ;;  %v35_v10 = vld [vmem:[#allocation2 + $0xc0] sm:$0xff]  ;;  %v34_v11 = vld [vmem:[#allocation2 + $0xb8] sm:$0xff]  ;;  %v33_v12 = vld [vmem:[#allocation2 + $0xb0] sm:$0xff] }
  0x12   :  { %320 = vmatpush3.msra.mxu1 %v41_v4  ;;  %352 = vmatprep.subr.mxu0 %v389_v0  ;;  %v32_v13 = vld [vmem:[#allocation2 + $0xa8] sm:$0xff]  ;;  %v31_v14 = vld [vmem:[#allocation2 + $0xa0] sm:$0xff]  ;;  %v30_v15 = vld [vmem:[#allocation2 + $0x98] sm:$0xff] }
  0x13   :  { %321 = vmatprep.subr.mxu1 %v389_v0  ;;  %354 = vmatprep.mubr.msk.f32.mxu0 %vm390_vm0, %v389_v0  ;;  %v29_v16 = vld [vmem:[#allocation2 + $0x90] sm:$0xff]  ;;  %v28_v17 = vld [vmem:[#allocation2 + $0x88] sm:$0xff]  ;;  %v27_v18 = vld [vmem:[#allocation2 + $0x80] sm:$0xff] }
  0x14   :  { %322 = vmatpush3.msra.mxu1 %v40_v5  ;;  %v287_v19 = vld [vmem:[#allocation2 + $0x100] ss:$0 sm:$0xff]  ;;  %v46_v24 = vld [vmem:[#allocation2 + $0x118] sm:$0xff]  ;;  %363 = vset.pattern.permute.xlu0 %v391_v25  ;;  %v290_v26 = vld [vmem:[#allocation2 + $0x108] ss:$0 sm:$0xff] }
  0x15   :  { %323 = vmatprep.subr.mxu1 %v389_v0  ;;  %207 = vperm.xlu0 %363, %v46_v24   ;;  %v45_v31 = vld [vmem:[#allocation2 + $0x110] sm:$0xff] }
  0x16   :  { %324 = vmatpush3.msra.mxu1 %v39_v6 }
  0x17   :  { %325 = vmatprep.subr.mxu1 %v389_v0 }
  0x18   :  { %326 = vmatpush3.msra.mxu1 %v38_v7 }
  0x19   :  { %327 = vmatprep.subr.mxu1 %v389_v0 }
  0x1a   :  { %328 = vmatpush3.msra.mxu1 %v37_v8 }
  0x1b   :  { %329 = vmatprep.subr.mxu1 %v389_v0 }
  0x1c   :  { %330 = vmatpush3.msra.mxu1 %v36_v9 }
  0x1d   :  { %331 = vmatprep.subr.mxu1 %v389_v0 }
  0x1e   :  { %332 = vmatpush3.msra.mxu1 %v35_v10 }
  0x1f   :  { %333 = vmatprep.subr.mxu1 %v389_v0 }
  0x20   :  { %334 = vmatpush3.msra.mxu1 %v34_v11 }
  0x21   :  { %335 = vmatprep.subr.mxu1 %v389_v0 }
  0x22   :  { %336 = vmatpush3.msra.mxu1 %v33_v12 }
  0x23   :  { %337 = vmatprep.subr.mxu1 %v389_v0 }
  0x24   :  { %338 = vmatpush3.msra.mxu1 %v32_v13 }
  0x25   :  { %339 = vmatprep.subr.mxu1 %v389_v0 }
  0x26   :  { %340 = vmatpush3.msra.mxu1 %v31_v14 }
  0x27   :  { %341 = vmatprep.subr.mxu1 %v389_v0 }
  0x28   :  { %342 = vmatpush3.msra.mxu1 %v30_v15 }
  0x29   :  { %343 = vmatprep.subr.mxu1 %v389_v0 }
  0x2a   :  { %344 = vmatpush3.msra.mxu1 %v29_v16 }
  0x2b   :  { %345 = vmatprep.subr.mxu1 %v389_v0 }
  0x2c   :  { %346 = vmatpush3.msra.mxu1 %v28_v17 }
  0x2d   :  { %347 = vmatprep.subr.mxu1 %v389_v0 }
  0x2e   :  { %348 = vmatpush3.msra.mxu1 %v27_v18 }
  0x90   :  { %v208_v32 = vpop.permute.xlu0 %207 }
  0xd1   :  { %v125_v20 = vpop.f32.mrf.mxu0 }
  0xd2   :  { %v126_v21 = vadd.f32 %v287_v19, %v125_v20 }
  0xd3   :  { %v316_v22 = vpop.f32.mrf.mxu0 }
  0xd4   :  { %v129_v23 = vmax.f32 %v126_v21, 0.0 }
  0xd6   :  { %350 = vmatmul.mubr.f32.vlgmr.msra.gmra.mxu1 %v129_v23 }
 0x196   :  { %v200_v27 = vpop.f32.mrf.mxu1 }
 0x197   :  { %v201_v28 = vadd.f32 %v290_v26, %v200_v27 }
 0x198   :  { %v351_v29 = vpop.f32.mrf.mxu1 }
 0x199   :  { %v204_v30 = vmax.f32 %v201_v28, 0.0 }
 0x19b   :  { %353 = vmatpush3.xpose.msra.mxu0 %v204_v30 }
 0x19e   :  { %355 = vmatmul.mubr.f32.vlgmr.msra.gmra.mxu0 %v45_v31 }
 0x25e   :  { %v276_v33 = vpop.f32.mrf.mxu0 }
 0x25f   :  { %v277_v34 = vadd.f32 %v276_v33, %v208_v32 }
 0x260   :  { %v356_v35 = vpop.f32.mrf.mxu0 }
 0x261   :  { %281 = vst.msk [vmem:[%s421_s2] sm:$0xff] %vm280_vm3, %v277_v34 }
 0x262   :  { %286 = vsyncpa [#allocation3], 1 }

</bundles_post_ra>
